<compile_context>
chip_gen: v7x
topology: tpu7x:2x2x1
jax: 0.10.0
libtpu: 0.0.40
codegen_flags: <defaults>
</compile_context>

<pallas_src>
import math

import jax
import jax.numpy as jnp
from jax.experimental import pallas as pl
from jax.experimental.pallas import tpu as pltpu


def woq_linear_kernel(x_ref, qw_ref, scale_ref, zp_ref, bias_ref, rowsum_ref,
                      o_ref, acc_ref):
    """One (tm, tn) output tile; K is the reduction grid axis (axis 2).

    x_ref      : (tm, tk) bfloat16  -- activations
    qw_ref     : (tk, tn) int8      -- prepacked quantized weight tile ([K, N] layout)
    scale_ref  : (1, tn)  float32   -- per-out-channel scale
    zp_ref     : (1, tn)  float32   -- per-out-channel zero point
    bias_ref   : (1, tn)  float32
    rowsum_ref : (tm, 1)  float32   -- sum_k x[m, k] (for deferred zero-point term)
    o_ref      : (tm, tn) float32
    acc_ref    : (tm, tn) float32 VMEM scratch accumulator
    """
    k = pl.program_id(2)

    @pl.when(k == 0)
    def _():
        acc_ref[...] = jnp.zeros_like(acc_ref)

    # Inner loop: pure int8->bf16 cast + MXU matmul.  Dequant is deferred to the
    # epilogue (algebraic identity: x @ ((q - zp) * s).T == s * (x @ q - zp * sum_k x)).
    acc_ref[...] += jnp.dot(
        x_ref[...],
        qw_ref[...].astype(jnp.bfloat16),
        preferred_element_type=jnp.float32,
    )

    @pl.when(k == pl.num_programs(2) - 1)
    def _():
        deq = (acc_ref[...] - rowsum_ref[...] * zp_ref[...]) * scale_ref[...]
        o_ref[...] = (deq + bias_ref[...]).astype(o_ref.dtype)


def _largest_divisor_tile(dim, target, step):
    """Largest multiple of `step` that divides `dim` and is <= target; else `dim`."""
    if dim <= target:
        return dim
    t = (target // step) * step
    while t >= step:
        if dim % t == 0:
            return t
        t -= step
    return dim


def woq_linear(x, qweight, scales, zero_points, bias, *,
               tm_max=256, tn_max=512, tk_max=512):
    """Weight-only-quantized linear: y = x @ dequant(qweight).T + bias."""
    orig_shape = x.shape
    K = orig_shape[-1]
    M = math.prod(orig_shape[:-1])
    N = qweight.shape[0]
    assert qweight.shape == (N, K)

    # Tile selection: cap tm (keeps VMEM for the weight stream; works on v7x's 64 MiB),
    # large lane-dense tn/tk for HBM-roofline weight streaming.
    tm = _largest_divisor_tile(M, tm_max, 16)   # bf16 sublane packing -> step 16
    tn = _largest_divisor_tile(N, tn_max, 128)
    tk = _largest_divisor_tile(K, tk_max, 128)
    assert M % tm == 0 and N % tn == 0 and K % tk == 0

    # Prepack: [N, K] -> [K, N] once in XLA (MXU-natural RHS layout, no in-kernel w.T).
    qw_kn = qweight.T                                          # int8 [K, N]
    x2 = x.reshape(M, K).astype(jnp.bfloat16)                  # bf16 activations
    # Row sums of the (bf16) activations, f32, for the deferred zero-point correction.
    x_rowsum = jnp.sum(x2.astype(jnp.float32), axis=1, keepdims=True)  # [M, 1]
    scales2 = scales.reshape(1, N).astype(jnp.float32)
    zps2 = zero_points.reshape(1, N).astype(jnp.float32)
    bias2 = bias.reshape(1, N).astype(jnp.float32)

    grid = (M // tm, N // tn, K // tk)

    cost = pl.CostEstimate(
        flops=2 * M * N * K,
        transcendentals=0,
        bytes_accessed=N * K            # int8 weight streamed once
        + M * K * 2                     # bf16 activations
        + M * N * 4                     # f32 output
        + 3 * N * 4 + M * 4,            # scale/zp/bias + rowsums
    )

    out = pl.pallas_call(
        woq_linear_kernel,
        out_shape=jax.ShapeDtypeStruct((M, N), jnp.float32),
        grid_spec=pltpu.PrefetchScalarGridSpec(
            num_scalar_prefetch=0,
            grid=grid,
            in_specs=[
                pl.BlockSpec((tm, tk), lambda i, j, k: (i, k)),   # x (bf16)
                pl.BlockSpec((tk, tn), lambda i, j, k: (k, j)),   # qweight [K,N] int8
                pl.BlockSpec((1, tn), lambda i, j, k: (0, j)),    # scales
                pl.BlockSpec((1, tn), lambda i, j, k: (0, j)),    # zero points
                pl.BlockSpec((1, tn), lambda i, j, k: (0, j)),    # bias
                pl.BlockSpec((tm, 1), lambda i, j, k: (i, 0)),    # x row sums
            ],
            out_specs=pl.BlockSpec((tm, tn), lambda i, j, k: (i, j)),
            scratch_shapes=[pltpu.VMEM((tm, tn), jnp.float32)],
        ),
        compiler_params=pltpu.CompilerParams(
            dimension_semantics=("parallel", "parallel", "arbitrary"),
            vmem_limit_bytes=64 * 1024 * 1024,
        ),
        cost_estimate=cost,
    )(x2, qw_kn, scales2, zps2, bias2, x_rowsum)

    return out.reshape(*orig_shape[:-1], N)


def quantize_per_channel_int8(w_fp):
    """Asymmetric per-output-channel int8 quantization (mirrors IPEX quantize_per_channel)."""
    qmin, qmax = -128.0, 127.0
    w_min = jnp.minimum(jnp.min(w_fp, axis=1), 0.0)
    w_max = jnp.maximum(jnp.max(w_fp, axis=1), 0.0)
    scales = jnp.maximum((w_max - w_min) / (qmax - qmin), 1e-8)
    zps = jnp.round(qmin - w_min / scales)
    q = jnp.clip(jnp.round(w_fp / scales[:, None]) + zps[:, None], qmin, qmax)
    return q.astype(jnp.int8), scales.astype(jnp.float32), zps.astype(jnp.float32)


if __name__ == "__main__":
    # Small LLM-like shapes consistent with nn.Linear forward.
    batch, seq = 2, 8
    in_features, out_features = 256, 256

    key = jax.random.PRNGKey(0)
    kx, kw, kb = jax.random.split(key, 3)

    x = jax.random.normal(kx, (batch, seq, in_features), dtype=jnp.float32)
    w_fp = jax.random.normal(kw, (out_features, in_features), dtype=jnp.float32) * 0.05
    bias = jax.random.normal(kb, (out_features,), dtype=jnp.float32) * 0.1

    # Deterministic "prepack": quantize the float weight per output channel.
    qweight, scales, zero_points = quantize_per_channel_int8(w_fp)

    y = woq_linear(x, qweight, scales, zero_points, bias)
    y = jax.block_until_ready(y)

    # Reference check: dequantized weight, bf16-rounded activations (the kernel feeds
    # the MXU bf16 activations with f32 accumulation).
    w_deq = (qweight.astype(jnp.float32) - zero_points[:, None]) * scales[:, None]
    x_bf = x.astype(jnp.bfloat16).astype(jnp.float32)
    y_ref = jnp.einsum("bsk,nk->bsn", x_bf, w_deq) + bias
    assert y.shape == (batch, seq, out_features)
    assert jnp.allclose(y, y_ref, atol=1e-2, rtol=1e-2), "mismatch vs reference"

    print("KERNEL_OK")
</pallas_src>

<mosaic_0001>
module attributes {stable_mosaic.version = 11 : i64} {
  func.func @woq_linear_kernel(%arg0: i32, %arg1: i32, %arg2: i32, %arg3: memref<16x256xbf16, #tpu.memory_space<vmem>>, %arg4: memref<256x256xi8, #tpu.memory_space<vmem>>, %arg5: memref<1x256xf32, #tpu.memory_space<vmem>>, %arg6: memref<1x256xf32, #tpu.memory_space<vmem>>, %arg7: memref<1x256xf32, #tpu.memory_space<vmem>>, %arg8: memref<16x1xf32, #tpu.memory_space<vmem>>, %arg9: memref<16x256xf32, #tpu.memory_space<vmem>>, %arg10: memref<16x256xf32, #tpu.memory_space<vmem>>) attributes {dimension_semantics = [#tpu.dimension_semantics<parallel>, #tpu.dimension_semantics<parallel>, #tpu.dimension_semantics<arbitrary>], iteration_bounds = array<i64: 1, 1, 1>, scalar_prefetch = 0 : i64, scratch_operands = 1 : i64, tpu.core_type = #tpu.core_type<tc>, window_params = [{transform_indices = @transform_0, window_bounds = array<i64: 16, 256>}, {transform_indices = @transform_1, window_bounds = array<i64: 256, 256>}, {transform_indices = @transform_2, window_bounds = array<i64: 1, 256>}, {transform_indices = @transform_3, window_bounds = array<i64: 1, 256>}, {transform_indices = @transform_4, window_bounds = array<i64: 1, 256>}, {transform_indices = @transform_5, window_bounds = array<i64: 16, 1>}, {transform_indices = @transform_6, window_bounds = array<i64: 16, 256>}]} {
    %c0_i32 = arith.constant 0 : i32
    %0 = arith.cmpi eq, %arg2, %c0_i32 : i32
    %1 = arith.extui %0 : i1 to i32
    %c0_i32_0 = arith.constant 0 : i32
    %2 = arith.cmpi ne, %1, %c0_i32_0 : i32
    scf.if %2 {
      %cst_10 = arith.constant 0.000000e+00 : f32
      %13 = vector.broadcast %cst_10 : f32 to vector<16x256xf32>
      %c0_11 = arith.constant 0 : index
      %c0_12 = arith.constant 0 : index
      %14 = vector.load %arg10[%c0_11, %c0_12] : memref<16x256xf32, #tpu.memory_space<vmem>>, vector<16x256xf32>
      tpu.vector_store %arg10[%c0_11, %c0_12], %13 {strides = array<i32>} : memref<16x256xf32, #tpu.memory_space<vmem>>, vector<16x256xf32>,
    } else {
    }
    %c0 = arith.constant 0 : index
    %c0_1 = arith.constant 0 : index
    %3 = vector.load %arg10[%c0, %c0_1] : memref<16x256xf32, #tpu.memory_space<vmem>>, vector<16x256xf32>
    %c0_2 = arith.constant 0 : index
    %c0_3 = arith.constant 0 : index
    %4 = vector.load %arg3[%c0_2, %c0_3] : memref<16x256xbf16, #tpu.memory_space<vmem>>, vector<16x256xbf16>
    %c0_4 = arith.constant 0 : index
    %c0_5 = arith.constant 0 : index
    %5 = vector.load %arg4[%c0_4, %c0_5] : memref<256x256xi8, #tpu.memory_space<vmem>>, vector<256x256xi8>
    %6 = arith.sitofp %5 : vector<256x256xi8> to vector<256x256xbf16>
    %cst = arith.constant dense<0.000000e+00> : vector<16x256xf32>
    %7 = tpu.matmul %4, %6, %cst {dimension_numbers = #tpu.dot_dimension_numbers<[1], [0], [0], [1], [0, 0, 1, 1], [], []>} : vector<16x256xbf16>, vector<256x256xbf16>, vector<16x256xf32> -> vector<16x256xf32>
    %8 = arith.addf %3, %7 : vector<16x256xf32>
    %c0_6 = arith.constant 0 : index
    %c0_7 = arith.constant 0 : index
    %9 = vector.load %arg10[%c0_6, %c0_7] : memref<16x256xf32, #tpu.memory_space<vmem>>, vector<16x256xf32>
    tpu.vector_store %arg10[%c0_6, %c0_7], %8 {strides = array<i32>} : memref<16x256xf32, #tpu.memory_space<vmem>>, vector<16x256xf32>,
    %c0_i32_8 = arith.constant 0 : i32
    %10 = arith.cmpi eq, %arg2, %c0_i32_8 : i32
    %11 = arith.extui %10 : i1 to i32
    %c0_i32_9 = arith.constant 0 : i32
    %12 = arith.cmpi ne, %11, %c0_i32_9 : i32
    scf.if %12 {
      %c0_10 = arith.constant 0 : index
      %c0_11 = arith.constant 0 : index
      %13 = vector.load %arg10[%c0_10, %c0_11] : memref<16x256xf32, #tpu.memory_space<vmem>>, vector<16x256xf32>
      %c0_12 = arith.constant 0 : index
      %c0_13 = arith.constant 0 : index
      %14 = vector.load %arg8[%c0_12, %c0_13] : memref<16x1xf32, #tpu.memory_space<vmem>>, vector<16x1xf32>
      %c0_14 = arith.constant 0 : index
      %c0_15 = arith.constant 0 : index
      %15 = vector.load %arg6[%c0_14, %c0_15] : memref<1x256xf32, #tpu.memory_space<vmem>>, vector<1x256xf32>
      %16 = vector.broadcast %14 : vector<16x1xf32> to vector<16x256xf32>
      %17 = vector.broadcast %15 : vector<1x256xf32> to vector<16x256xf32>
      %18 = arith.mulf %16, %17 : vector<16x256xf32>
      %19 = arith.subf %13, %18 : vector<16x256xf32>
      %c0_16 = arith.constant 0 : index
      %c0_17 = arith.constant 0 : index
      %20 = vector.load %arg5[%c0_16, %c0_17] : memref<1x256xf32, #tpu.memory_space<vmem>>, vector<1x256xf32>
      %21 = vector.broadcast %20 : vector<1x256xf32> to vector<16x256xf32>
      %22 = arith.mulf %19, %21 : vector<16x256xf32>
      %c0_18 = arith.constant 0 : index
      %c0_19 = arith.constant 0 : index
      %23 = vector.load %arg7[%c0_18, %c0_19] : memref<1x256xf32, #tpu.memory_space<vmem>>, vector<1x256xf32>
      %24 = vector.broadcast %23 : vector<1x256xf32> to vector<16x256xf32>
      %25 = arith.addf %22, %24 : vector<16x256xf32>
      %c0_20 = arith.constant 0 : index
      %c0_21 = arith.constant 0 : index
      %26 = vector.load %arg9[%c0_20, %c0_21] : memref<16x256xf32, #tpu.memory_space<vmem>>, vector<16x256xf32>
      tpu.vector_store %arg9[%c0_20, %c0_21], %25 {strides = array<i32>} : memref<16x256xf32, #tpu.memory_space<vmem>>, vector<16x256xf32>,
    } else {
    }
    return
  }
  func.func @transform_0(%arg0: i32, %arg1: i32, %arg2: i32) -> (i32, i32) {
    %c0_i32 = arith.constant 0 : i32
    return %arg0, %arg2 : i32, i32
  }
  func.func @transform_1(%arg0: i32, %arg1: i32, %arg2: i32) -> (i32, i32) {
    %c0_i32 = arith.constant 0 : i32
    return %arg2, %arg1 : i32, i32
  }
  func.func @transform_2(%arg0: i32, %arg1: i32, %arg2: i32) -> (i32, i32) {
    %c0_i32 = arith.constant 0 : i32
    %c0_i32_0 = arith.constant 0 : i32
    return %c0_i32, %arg1 : i32, i32
  }
  func.func @transform_3(%arg0: i32, %arg1: i32, %arg2: i32) -> (i32, i32) {
    %c0_i32 = arith.constant 0 : i32
    %c0_i32_0 = arith.constant 0 : i32
    return %c0_i32, %arg1 : i32, i32
  }
  func.func @transform_4(%arg0: i32, %arg1: i32, %arg2: i32) -> (i32, i32) {
    %c0_i32 = arith.constant 0 : i32
    %c0_i32_0 = arith.constant 0 : i32
    return %c0_i32, %arg1 : i32, i32
  }
  func.func @transform_5(%arg0: i32, %arg1: i32, %arg2: i32) -> (i32, i32) {
    %c0_i32 = arith.constant 0 : i32
    %c0_i32_0 = arith.constant 0 : i32
    return %arg0, %c0_i32 : i32, i32
  }
  func.func @transform_6(%arg0: i32, %arg1: i32, %arg2: i32) -> (i32, i32) {
    %c0_i32 = arith.constant 0 : i32
    return %arg0, %arg1 : i32, i32
  }
}

</mosaic_0001>

<bundles_post_ra>
// kernel: tpu_custom_call.1
= control target key start
LH: loop header
LB: loop body
LE: loop exit
PB: predicated region body
PF: predicated region fallthrough
CT: control target
= control target key end

     0   :  { %11 = vsyncpa [#allocation4], 0  ;;  %s643_s0 = inlined_call_operand.hbm [shape: bf16[16,256], index: 0, kind: input, shape index: {}]   ;;  %s644_s1 = inlined_call_operand.hbm [shape: s8[256,256], index: 1, kind: input, shape index: {}]   ;;  %s645_s2 = inlined_call_operand.hbm [shape: f32[1,256], index: 2, kind: input, shape index: {}]   ;;  %s646_s3 = inlined_call_operand.hbm [shape: f32[1,256], index: 3, kind: input, shape index: {}]   ;;  %s647_s4 = inlined_call_operand.hbm [shape: f32[1,256], index: 4, kind: input, shape index: {}]   ;;  %s648_s5 = inlined_call_operand.hbm [shape: f32[16,1], index: 5, kind: input, shape index: {}]   ;;  %s649_s6 = inlined_call_operand.hbm [shape: f32[16,256], index: 6, kind: output, shape index: {}]  }
   0x1   :  { %12 = vsyncpa [#allocation7], 0 }
   0x2   :  { %13 = vsyncpa [#allocation10], 0 }
   0x3   :  { %14 = vsyncpa [#allocation13], 0 }
   0x4   :  { %15 = vsyncpa [#allocation5], 0  ;;  %s500_s21 = smov [#allocation6]   ;;  %s336_s25 = scalar_lea.hbm %s644_s1, 2048 }
   0x5   :  { %s33_s22 = sshll.u32 %s500_s21, 4  ;;  %p337_p0 = scmp.ne.s32.totalorder %s644_s1, %s336_s25  ;;  %s34_s22 = int_to_ptr.vmem [resolvable:$true] %s33_s22 }
   0x6   :  { %p340_p1 = scmp.lt.u32.totalorder %s336_s25, %s644_s1 }
   0x8   :  { %p342_p2 = pnand %p340_p1, %p337_p0 }
   0xa   :  { %345 = shalt.err (!%p342_p2)
}
   0xb   :  { %s346_s30 = scalar_lea.vmem %s34_s22, 2048  ;;  %p351_p4 = scmp.lt.s32.totalorder %s34_s22, %s34_s22 }
   0xc   :  { %p347_p3 = scmp.ne.s32.totalorder %s34_s22, %s346_s30  ;;  %p352_p5 = scmp.lt.s32.totalorder %s346_s30, %s346_s30 }
   0xe   :  { %p353_p6 = por %p352_p5, %p351_p4 }
  0x10   :  { %p354_p7 = pnand %p353_p6, %p347_p3 }
  0x12   :  { %357 = shalt.err (!%p354_p7)
}
  0x13   :  { %s501_s7 = smov 256   ;;  %s502_s8 = smov 16  }
  0x14   :  { %39 = dma.hbm_to_vmem [thread:$0]  %s644_s1, 2048, %s34_s22, [#allocation7], %s501_s7, %s501_s7, %s502_s8  }
  0x15   :  { %s503_s11 = smov [#allocation9]   ;;  %s504_s13 = smov [#allocation3]  }
  0x16   :  { %s56_s12 = sshll.u32 %s503_s11, 4  ;;  %s21_s14 = sshll.u32 %s504_s13, 4  ;;  %s57_s12 = int_to_ptr.vmem [resolvable:$true] %s56_s12  ;;  %s22_s14 = int_to_ptr.vmem [resolvable:$true] %s21_s14 }
  0x17   :  { %s358_s17 = scalar_lea.hbm %s646_s3, 32 }
  0x18   :  { %p359_p8 = scmp.ne.s32.totalorder %s646_s3, %s358_s17  ;;  %p362_p9 = scmp.lt.u32.totalorder %s358_s17, %s646_s3 }
  0x1a   :  { %p364_p10 = pnand %p362_p9, %p359_p8 }
  0x1c   :  { %367 = shalt.err (!%p364_p10)
}
  0x1d   :  { %s368_s1 = scalar_lea.vmem %s57_s12, 32  ;;  %p373_p12 = scmp.lt.s32.totalorder %s57_s12, %s57_s12 }
  0x1e   :  { %p369_p11 = scmp.ne.s32.totalorder %s57_s12, %s368_s1  ;;  %p374_p13 = scmp.lt.s32.totalorder %s368_s1, %s368_s1 }
  0x20   :  { %p375_p0 = por %p374_p13, %p373_p12 }
  0x22   :  { %p376_p1 = pnand %p375_p0, %p369_p11 }
  0x24   :  { %379 = shalt.err (!%p376_p1)
}
  0x25   :  { %59 = dma.hbm_to_vmem [thread:$0]  %s646_s3, 32, %s57_s12, [#allocation10]  }
  0x26   :  { %s380_s26 = scalar_lea.hbm %s643_s0, 256 }
  0x27   :  { %p381_p2 = scmp.ne.s32.totalorder %s643_s0, %s380_s26  ;;  %p384_p3 = scmp.lt.u32.totalorder %s380_s26, %s643_s0 }
  0x29   :  { %p386_p4 = pnand %p384_p3, %p381_p2 }
  0x2b   :  { %389 = shalt.err (!%p386_p4)
}
  0x2c   :  { %s390_s9 = scalar_lea.vmem %s22_s14, 256  ;;  %p395_p6 = scmp.lt.s32.totalorder %s22_s14, %s22_s14 }
  0x2d   :  { %p391_p5 = scmp.ne.s32.totalorder %s22_s14, %s390_s9  ;;  %p396_p7 = scmp.lt.s32.totalorder %s390_s9, %s390_s9 }
  0x2f   :  { %p397_p8 = por %p396_p7, %p395_p6 }
  0x31   :  { %p398_p9 = pnand %p397_p8, %p391_p5 }
  0x33   :  { %401 = shalt.err (!%p398_p9)
}
  0x34   :  { %s505_s3 = smov 128   ;;  %s506_s10 = smov 8  }
  0x35   :  { %27 = dma.hbm_to_vmem [thread:$0]  %s643_s0, 256, %s22_s14, [#allocation4], %s505_s3, %s505_s3, %s506_s10  }
  0x36   :  { %s507_s13 = smov [#allocation8]   ;;  %s508_s16 = smov [#allocation11]  }
  0x37   :  { %s46_s15 = sshll.u32 %s507_s13, 4  ;;  %s66_s17 = sshll.u32 %s508_s16, 4  ;;  %s47_s15 = int_to_ptr.vmem [resolvable:$true] %s46_s15  ;;  %s67_s17 = int_to_ptr.vmem [resolvable:$true] %s66_s17 }
  0x38   :  { %s402_s20 = scalar_lea.hbm %s645_s2, 32 }
  0x39   :  { %p403_p10 = scmp.ne.s32.totalorder %s645_s2, %s402_s20  ;;  %p406_p11 = scmp.lt.u32.totalorder %s402_s20, %s645_s2 }
  0x3b   :  { %p408_p12 = pnand %p406_p11, %p403_p10 }
  0x3d   :  { %411 = shalt.err (!%p408_p12)
}
  0x3e   :  { %s412_s0 = scalar_lea.vmem %s47_s15, 32  ;;  %p417_p0 = scmp.lt.s32.totalorder %s47_s15, %s47_s15 }
  0x3f   :  { %p413_p13 = scmp.ne.s32.totalorder %s47_s15, %s412_s0  ;;  %p418_p1 = scmp.lt.s32.totalorder %s412_s0, %s412_s0 }
  0x41   :  { %p419_p2 = por %p418_p1, %p417_p0 }
  0x43   :  { %p420_p3 = pnand %p419_p2, %p413_p13 }
  0x45   :  { %423 = shalt.err (!%p420_p3)
}
  0x46   :  { %49 = dma.hbm_to_vmem [thread:$0]  %s645_s2, 32, %s47_s15, [#allocation7]  }
  0x47   :  { %s424_s27 = scalar_lea.hbm %s647_s4, 32 }
  0x48   :  { %p425_p4 = scmp.ne.s32.totalorder %s647_s4, %s424_s27  ;;  %p428_p5 = scmp.lt.u32.totalorder %s424_s27, %s647_s4 }
  0x4a   :  { %p430_p6 = pnand %p428_p5, %p425_p4 }
  0x4c   :  { %433 = shalt.err (!%p430_p6)
}
  0x4d   :  { %s434_s11 = scalar_lea.vmem %s67_s17, 32  ;;  %p439_p8 = scmp.lt.s32.totalorder %s67_s17, %s67_s17 }
  0x4e   :  { %p435_p7 = scmp.ne.s32.totalorder %s67_s17, %s434_s11  ;;  %p440_p9 = scmp.lt.s32.totalorder %s434_s11, %s434_s11 }
  0x50   :  { %p441_p10 = por %p440_p9, %p439_p8 }
  0x52   :  { %p442_p11 = pnand %p441_p10, %p435_p7 }
  0x54   :  { %445 = shalt.err (!%p442_p11)
}
  0x55   :  { %69 = dma.hbm_to_vmem [thread:$0]  %s647_s4, 32, %s67_s17, [#allocation10]  }
  0x56   :  { %s509_s13 = smov [#allocation12]   ;;  %s446_s19 = scalar_lea.hbm %s648_s5, 256 }
  0x57   :  { %s75_s15 = sshll.u32 %s509_s13, 4  ;;  %p447_p12 = scmp.ne.s32.totalorder %s648_s5, %s446_s19  ;;  %s76_s15 = int_to_ptr.vmem [resolvable:$true] %s75_s15 }
  0x58   :  { %p450_p13 = scmp.lt.u32.totalorder %s446_s19, %s648_s5 }
  0x5a   :  { %p452_p0 = pnand %p450_p13, %p447_p12 }
  0x5c   :  { %455 = shalt.err (!%p452_p0)
}
  0x5d   :  { %s456_s23 = scalar_lea.vmem %s76_s15, 256  ;;  %p461_p2 = scmp.lt.s32.totalorder %s76_s15, %s76_s15 }
  0x5e   :  { %p457_p1 = scmp.ne.s32.totalorder %s76_s15, %s456_s23  ;;  %p462_p3 = scmp.lt.s32.totalorder %s456_s23, %s456_s23 }
  0x60   :  { %p463_p4 = por %p462_p3, %p461_p2 }
  0x62   :  { %p464_p5 = pnand %p463_p4, %p457_p1 }
  0x64   :  { %467 = shalt.err (!%p464_p5)
}
  0x65   :  { %81 = dma.hbm_to_vmem [thread:$0]  %s648_s5, 256, %s76_s15, [#allocation13], %s505_s3, %s505_s3, %s506_s10  }
  0x66   :  { %490 = dma.done.wait [#allocation4], 256  }
  0x67   :  { %491 = vsyncadd [#allocation4], 4294967040 }
  0x68   :  { %492 = dma.done.wait [#allocation7], 2080  }
  0x69   :  { %493 = vsyncadd [#allocation7], 4294965216 }
  0x6a   :  { %494 = dma.done.wait [#allocation10], 64  }
  0x6b   :  { %495 = vsyncadd [#allocation10], 4294967232 }
  0x6c   :  { %496 = dma.done.wait [#allocation13], 256  }
  0x6d   :  { %497 = vsyncadd [#allocation13], 4294967040  ;;  %v510_v0 = vmov 0   ;;  %v115_v1 = vld [vmem:[#allocation6 + $0x8] sm:$0xff]  ;;  %v114_v2 = vld [vmem:[#allocation6] sm:$0xff]  ;;  %v244_v53 = vlaneseq  ;;  %s511_s5 = smov [#allocation14]  }
  0x6e   :  { %332 = vset.pattern.permute.xlu0 %v510_v0  ;;  %v131_v3 = vunpack.c.l.s8.bf16 %v115_v1  ;;  %v133_v4 = vunpack.c.h.s8.bf16 %v115_v1  ;;  %v130_v5 = vunpack.c.l.s8.bf16 %v114_v2  ;;  %v117_v6 = vld [vmem:[#allocation6 + $0x18] sm:$0xff]  ;;  %v132_v7 = vunpack.c.h.s8.bf16 %v114_v2  ;;  %v116_v9 = vld [vmem:[#allocation6 + $0x10] sm:$0xff]  ;;  %v230_v11 = vld [vmem:[#allocation12] sm:$0xff]  ;;  %s303_s3 = sshll.u32 %s511_s5, 4  ;;  %s304_s3 = int_to_ptr.vmem [resolvable:$true] %s303_s3 }
  0x6f   :  { %v135_v8 = vunpack.c.l.s8.bf16 %v117_v6  ;;  %v335_v10 = vld [vmem:[#allocation3 + $0x4] ss:$8 sps:$4 sm:$0xff]   ;;  %235 = vperm.xlu0 %332, %v230_v11   ;;  %v134_v12 = vunpack.c.l.s8.bf16 %v116_v9  ;;  %v137_v14 = vunpack.c.h.s8.bf16 %v117_v6  ;;  %v119_v15 = vld [vmem:[#allocation6 + $0x28] sm:$0xff]  ;;  %v136_v16 = vunpack.c.h.s8.bf16 %v116_v9  ;;  %v118_v18 = vld [vmem:[#allocation6 + $0x20] sm:$0xff]  ;;  %s468_s10 = scalar_lea.vmem %s304_s3, 512  ;;  %p473_p7 = scmp.lt.s32.totalorder %s304_s3, %s304_s3 }
  0x70   :  { %172 = vmatprep.subr.bf16.mxu0 %v131_v3  ;;  %204 = vmatprep.mubr.bf16.mxu0 %v335_v10  ;;  %v231_v13 = vld [vmem:[#allocation12 + $0x8] sm:$0xff]  ;;  %v139_v17 = vunpack.c.l.s8.bf16 %v119_v15  ;;  %v138_v19 = vunpack.c.l.s8.bf16 %v118_v18  ;;  %v141_v20 = vunpack.c.h.s8.bf16 %v119_v15  ;;  %v121_v21 = vld [vmem:[#allocation6 + $0x38] sm:$0xff]  ;;  %v140_v22 = vunpack.c.h.s8.bf16 %v118_v18  ;;  %v122_v30 = vld [vmem:[#allocation6 + $0x40] sm:$0xff]  ;;  %p469_p6 = scmp.ne.s32.totalorder %s304_s3, %s468_s10  ;;  %p474_p8 = scmp.lt.s32.totalorder %s468_s10, %s468_s10 }
  0x71   :  { %173 = vmatpush1.bf16.msra.mxu0 %v130_v5  ;;  %v143_v23 = vunpack.c.l.s8.bf16 %v121_v21  ;;  %v120_v24 = vld [vmem:[#allocation6 + $0x30] sm:$0xff]  ;;  %v145_v26 = vunpack.c.h.s8.bf16 %v121_v21  ;;  %v123_v27 = vld [vmem:[#allocation6 + $0x48] sm:$0xff]  ;;  %v146_v31 = vunpack.c.l.s8.bf16 %v122_v30  ;;  %v125_v33 = vld [vmem:[#allocation6 + $0x58] sm:$0xff]  ;;  %v148_v34 = vunpack.c.h.s8.bf16 %v122_v30 }
  0x72   :  { %174 = vmatprep.subr.bf16.mxu0 %v133_v4  ;;  %v142_v25 = vunpack.c.l.s8.bf16 %v120_v24  ;;  %v144_v28 = vunpack.c.h.s8.bf16 %v120_v24  ;;  %v147_v29 = vunpack.c.l.s8.bf16 %v123_v27  ;;  %v149_v32 = vunpack.c.h.s8.bf16 %v123_v27  ;;  %v124_v36 = vld [vmem:[#allocation6 + $0x50] sm:$0xff]  ;;  %v127_v39 = vld [vmem:[#allocation6 + $0x68] sm:$0xff]  ;;  %v126_v42 = vld [vmem:[#allocation6 + $0x60] sm:$0xff]  ;;  %p475_p9 = por %p474_p8, %p473_p7 }
  0x73   :  { %240 = vperm.xlu0 %332, %v231_v13   ;;  %v151_v35 = vunpack.c.l.s8.bf16 %v125_v33  ;;  %v150_v37 = vunpack.c.l.s8.bf16 %v124_v36  ;;  %v153_v38 = vunpack.c.h.s8.bf16 %v125_v33  ;;  %v152_v40 = vunpack.c.h.s8.bf16 %v124_v36  ;;  %v129_v45 = vld [vmem:[#allocation6 + $0x78] sm:$0xff]  ;;  %v128_v48 = vld [vmem:[#allocation6 + $0x70] sm:$0xff]  ;;  %v232_v56 = vld [vmem:[#allocation9] sm:$0x3] }
  0x74   :  { %v155_v41 = vunpack.c.l.s8.bf16 %v127_v39  ;;  %v154_v43 = vunpack.c.l.s8.bf16 %v126_v42  ;;  %v157_v44 = vunpack.c.h.s8.bf16 %v127_v39  ;;  %v156_v46 = vunpack.c.h.s8.bf16 %v126_v42  ;;  %v333_v52 = vld [vmem:[#allocation3] ss:$8 sps:$4 sm:$0xff]   ;;  %v262_v61 = vld [vmem:[#allocation8] sm:$0x3]  ;;  %v278_v0 = vld [vmem:[#allocation11] sm:$0x3]  ;;  %p476_p10 = pnand %p475_p9, %p469_p6 }
  0x75   :  { %175 = vmatpush1.bf16.msra.mxu0 %v132_v7  ;;  %v159_v47 = vunpack.c.l.s8.bf16 %v129_v45  ;;  %v158_v49 = vunpack.c.l.s8.bf16 %v128_v48  ;;  %v161_v50 = vunpack.c.h.s8.bf16 %v129_v45  ;;  %v160_v51 = vunpack.c.h.s8.bf16 %v128_v48 }
  0x76   :  { %176 = vmatprep.subr.bf16.mxu0 %v135_v8  ;;  %v245_v54 = vshrl.u32 %v244_v53, 7 }
  0x78   :  { %v246_v55 = vsub.s32 0, %v245_v54  ;;  %v250_v57 = vsub.s32 1, %v245_v54 }
  0x79   :  { %177 = vmatpush1.bf16.msra.mxu0 %v134_v12 }
  0x7a   :  { %178 = vmatprep.subr.bf16.mxu0 %v137_v14  ;;  %v247_v59 = vrot.slane %v232_v56, %v246_v55  ;;  %v251_v60 = vrot.slane %v232_v56, %v250_v57  ;;  %v267_v1 = vrot.slane %v262_v61, %v246_v55  ;;  %v271_v4 = vrot.slane %v262_v61, %v250_v57 }
  0x7b   :  { %v283_v7 = vrot.slane %v278_v0, %v246_v55  ;;  %v287_v11 = vrot.slane %v278_v0, %v250_v57 }
  0x7d   :  { %179 = vmatpush1.bf16.msra.mxu0 %v136_v16 }
  0x7e   :  { %180 = vmatprep.subr.bf16.mxu0 %v139_v17 }
  0x81   :  { %181 = vmatpush1.bf16.msra.mxu0 %v138_v19 }
  0x82   :  { %182 = vmatprep.subr.bf16.mxu0 %v141_v20 }
  0x85   :  { %183 = vmatpush1.bf16.msra.mxu0 %v140_v22 }
  0x86   :  { %184 = vmatprep.subr.bf16.mxu0 %v143_v23 }
  0x89   :  { %185 = vmatpush1.bf16.msra.mxu0 %v142_v25 }
  0x8a   :  { %186 = vmatprep.subr.bf16.mxu0 %v145_v26 }
  0x8d   :  { %187 = vmatpush1.bf16.msra.mxu0 %v144_v28 }
  0x8e   :  { %188 = vmatprep.subr.bf16.mxu0 %v147_v29 }
  0x91   :  { %189 = vmatpush1.bf16.msra.mxu0 %v146_v31 }
  0x92   :  { %190 = vmatprep.subr.bf16.mxu0 %v149_v32 }
  0x95   :  { %191 = vmatpush1.bf16.msra.mxu0 %v148_v34 }
  0x96   :  { %192 = vmatprep.subr.bf16.mxu0 %v151_v35 }
  0x99   :  { %193 = vmatpush1.bf16.msra.mxu0 %v150_v37 }
  0x9a   :  { %194 = vmatprep.subr.bf16.mxu0 %v153_v38 }
  0x9d   :  { %195 = vmatpush1.bf16.msra.mxu0 %v152_v40 }
  0x9e   :  { %196 = vmatprep.subr.bf16.mxu0 %v155_v41 }
  0xa1   :  { %197 = vmatpush1.bf16.msra.mxu0 %v154_v43 }
  0xa2   :  { %198 = vmatprep.subr.bf16.mxu0 %v157_v44 }
  0xa5   :  { %199 = vmatpush1.bf16.msra.mxu0 %v156_v46 }
  0xa6   :  { %200 = vmatprep.subr.bf16.mxu0 %v159_v47 }
  0xa9   :  { %201 = vmatpush1.bf16.msra.mxu0 %v158_v49 }
  0xaa   :  { %202 = vmatprep.subr.bf16.mxu0 %v161_v50 }
  0xad   :  { %203 = vmatpush1.bf16.msra.mxu0 %v160_v51 }
  0xb0   :  { %205 = vmatmul.mubr.bf16.vlgmr.msra.gmra.mrb[0].mxu0 %v333_v52 }
  0xee   :  { %v236_v58 = vpop.permute.xlu0 %235 }
  0xef   :  { %v254_v62 = vmul.f32 %v247_v59, %v236_v58  ;;  %v255_v2 = vmul.f32 %v251_v60, %v236_v58 }
  0xf2   :  { %v241_v63 = vpop.permute.xlu0 %240 }
  0xf3   :  { %v256_v5 = vmul.f32 %v247_v59, %v241_v63  ;;  %v257_v9 = vmul.f32 %v251_v60, %v241_v63 }
 0x183   :  { %v206_v3 = vpop.f32.mrb[0].mxu0 }
 0x184   :  { %v258_v6 = vsub.f32 %v206_v3, %v254_v62  ;;  %v208_v8 = vpop.f32.mrb[1].mxu0 }
 0x185   :  { %v259_v10 = vsub.f32 %v208_v8, %v255_v2  ;;  %v210_v12 = vpop.f32.mrb[2].mxu0 }
 0x186   :  { %v274_v13 = vmul.f32 %v267_v1, %v258_v6  ;;  %v260_v14 = vsub.f32 %v210_v12, %v256_v5  ;;  %v212_v15 = vpop.f32.mrb[3].mxu0 }
 0x187   :  { %v275_v16 = vmul.f32 %v271_v4, %v259_v10  ;;  %v261_v17 = vsub.f32 %v212_v15, %v257_v9 }
 0x188   :  { %v290_v18 = vadd.f32 %v283_v7, %v274_v13  ;;  %v276_v19 = vmul.f32 %v267_v1, %v260_v14 }
 0x189   :  { %v291_v20 = vadd.f32 %v287_v11, %v275_v16  ;;  %v277_v21 = vmul.f32 %v271_v4, %v261_v17 }
 0x18a   :  { %294 = vst [vmem:[#allocation14] sm:$0xff] %v290_v18  ;;  %v292_v22 = vadd.f32 %v283_v7, %v276_v19 }
 0x18b   :  { %295 = vst [vmem:[#allocation14 + $0x8] sm:$0xff] %v291_v20  ;;  %v293_v23 = vadd.f32 %v287_v11, %v277_v21 }
 0x18c   :  { %296 = vst [vmem:[#allocation14 + $0x10] sm:$0xff] %v292_v22 }
 0x18d   :  { %297 = vst [vmem:[#allocation14 + $0x18] sm:$0xff] %v293_v23 }
 0x18e   :  { %479 = shalt.err (!%p476_p10)
}
 0x18f   :  { %s480_s24 = scalar_lea.hbm %s649_s6, 512 }
 0x190   :  { %p481_p11 = scmp.ne.s32.totalorder %s649_s6, %s480_s24  ;;  %p484_p12 = scmp.lt.u32.totalorder %s480_s24, %s649_s6 }
 0x192   :  { %p486_p13 = pnand %p484_p12, %p481_p11 }
 0x194   :  { %489 = shalt.err (!%p486_p13)
}
 0x195   :  { %309 = dma.vmem_to_hbm [thread:$0]  %s304_s3, 512, %s649_s6, [#allocation5], %s501_s7, %s501_s7, %s502_s8  }
 0x196   :  { %498 = dma.done.wait [#allocation5], 512  }
 0x197   :  { %499 = vsyncadd [#allocation5], 4294966784 }
 0x198   :  { %313 = vsyncpa [#allocation4], 1 }
 0x199   :  { %314 = vsyncpa [#allocation7], 1 }
 0x19a   :  { %315 = vsyncpa [#allocation10], 1 }
 0x19b   :  { %316 = vsyncpa [#allocation13], 1 }
 0x19c   :  { %317 = vsyncpa [#allocation5], 1 }

</bundles_post_ra>
